<compile_context>
chip_gen: v6e
topology: v6e:2x2x1
jax: 0.10.0
libtpu: 0.0.40
codegen_flags: <defaults>
</compile_context>

<pallas_src>
import functools

import jax
import jax.numpy as jnp
from jax import lax
from jax.experimental import pallas as pl
from jax.experimental.pallas import tpu as pltpu


def _tile(dim, cap, align, min_blocks=1):
    """Largest tile <= cap that is a multiple of `align` and divides `dim`.

    Falls back to the full dimension (always legal for Mosaic) if no such
    divisor exists.  If `min_blocks > 1`, the tile is halved (while staying
    aligned and dividing `dim`) so the grid axis has at least `min_blocks`
    blocks — keeps both v7x TensorCores busy on "parallel" axes.
    """
    t = dim
    if dim > cap:
        t = (cap // align) * align
        while t >= align and dim % t != 0:
            t -= align
        if t < align:
            t = dim  # fallback: full dimension
    while (min_blocks > 1 and dim // t < min_blocks
           and t % (2 * align) == 0 and dim % (t // 2) == 0):
        t //= 2
    return t


# ----------------------------------------------------------------------------
# Tiled linear layer:  out = x @ w (+ b)      (bf16 MXU operands, f32 acc)
# ----------------------------------------------------------------------------
def _make_linear_kernel(has_bias):
    def kernel(*args):
        if has_bias:
            x_ref, w_ref, b_ref, o_ref, acc_ref = args
        else:
            x_ref, w_ref, o_ref, acc_ref = args
            b_ref = None
        k = pl.program_id(2)

        @pl.when(k == 0)
        def _():
            acc_ref[...] = jnp.zeros_like(acc_ref)

        acc_ref[...] += jnp.dot(
            x_ref[...].astype(jnp.bfloat16),
            w_ref[...].astype(jnp.bfloat16),
            preferred_element_type=jnp.float32,
        )

        @pl.when(k == pl.num_programs(2) - 1)
        def _():
            r = acc_ref[...]
            if has_bias:
                r = r + b_ref[...]
            o_ref[...] = r.astype(o_ref.dtype)

    return kernel


def linear(x2d, w, b=None, *, out_dtype=None, tm_cap=256, tn_cap=512, tk_cap=512):
    M, K = x2d.shape
    K2, N = w.shape
    assert K == K2
    out_dtype = out_dtype or x2d.dtype

    tm = _tile(M, tm_cap, 8, min_blocks=2)   # >=2 M-blocks when possible (v7x)
    tn = _tile(N, tn_cap, 128)
    tk = _tile(K, tk_cap, 128)

    has_bias = b is not None
    in_specs = [
        pl.BlockSpec((tm, tk), lambda i, j, k: (i, k)),
        pl.BlockSpec((tk, tn), lambda i, j, k: (k, j)),
    ]
    args = [x2d, w]
    if has_bias:
        in_specs.append(pl.BlockSpec((1, tn), lambda i, j, k: (0, j)))
        args.append(b.reshape(1, N).astype(jnp.float32))

    return pl.pallas_call(
        _make_linear_kernel(has_bias),
        out_shape=jax.ShapeDtypeStruct((M, N), out_dtype),
        grid_spec=pltpu.PrefetchScalarGridSpec(
            num_scalar_prefetch=0,
            grid=(M // tm, N // tn, K // tk),
            in_specs=in_specs,
            out_specs=pl.BlockSpec((tm, tn), lambda i, j, k: (i, j)),
            scratch_shapes=[pltpu.VMEM((tm, tn), jnp.float32)],
        ),
        compiler_params=pltpu.CompilerParams(
            dimension_semantics=("parallel", "parallel", "arbitrary")
        ),
    )(*args)


# ----------------------------------------------------------------------------
# Flash-style attention core.
#
# Reads q/k/v tiles directly from qkv shaped (B, N, 3, H, dh); processes all
# H heads per grid step; writes the output already in (B, N, H*dh) layout
# with a single lane-dense (tq, H*dh) store per q tile.
# ----------------------------------------------------------------------------
def _attn_kernel(q_ref, k_ref, v_ref, o_ref, m_sc, l_sc, acc_sc, *, scale, heads):
    ki = pl.program_id(2)

    @pl.when(ki == 0)
    def _():
        m_sc[...] = jnp.full_like(m_sc, -jnp.inf)
        l_sc[...] = jnp.zeros_like(l_sc)
        acc_sc[...] = jnp.zeros_like(acc_sc)

    q = q_ref[...].astype(jnp.bfloat16)   # (tq,  H, dh)
    k = k_ref[...].astype(jnp.bfloat16)   # (tkv, H, dh)
    v = v_ref[...].astype(jnp.bfloat16)   # (tkv, H, dh)

    # s[h, i, j] = sum_d q[i, h, d] * k[j, h, d]   (batch over h, no k relayout)
    s = lax.dot_general(
        q, k, (((2,), (2,)), ((1,), (1,))),
        preferred_element_type=jnp.float32,
    ) * scale                                               # (H, tq, tkv) f32

    m_prev = m_sc[...]                                       # (H, tq, 1)
    m_new = jnp.maximum(m_prev, s.max(axis=-1, keepdims=True))
    alpha = jnp.exp(m_prev - m_new)
    p = jnp.exp(s - m_new)                                   # f32

    l_sc[...] = alpha * l_sc[...] + p.sum(axis=-1, keepdims=True)
    acc_sc[...] = alpha * acc_sc[...] + lax.dot_general(
        p.astype(jnp.bfloat16), v, (((2,), (0,)), ((0,), (1,))),
        preferred_element_type=jnp.float32,
    )                                                        # (H, tq, dh)
    m_sc[...] = m_new

    @pl.when(ki == pl.num_programs(2) - 1)
    def _():
        parts = []
        for h in range(heads):
            inv_l = pl.reciprocal(l_sc[h], approx=True)      # (tq, 1), EUP
            parts.append((acc_sc[h] * inv_l).astype(o_ref.dtype))
        o_ref[...] = jnp.concatenate(parts, axis=-1)         # (tq, H*dh) lane-dense


def flash_attention(qkv, *, heads, dim_head, scale, tq_cap=256, tkv_cap=128):
    B, N, three, H, dh = qkv.shape
    assert three == 3 and H == heads and dh == dim_head
    inner = H * dh

    tq = _tile(N, tq_cap, 8)
    tkv = _tile(N, tkv_cap, 8)
    kernel = functools.partial(_attn_kernel, scale=scale, heads=H)

    return pl.pallas_call(
        kernel,
        out_shape=jax.ShapeDtypeStruct((B, N, inner), qkv.dtype),
        grid_spec=pltpu.PrefetchScalarGridSpec(
            num_scalar_prefetch=0,
            grid=(B, N // tq, N // tkv),
            in_specs=[
                pl.BlockSpec((None, tq, None, H, dh),
                             lambda b, qi, ki: (b, qi, 0, 0, 0)),   # q chunk
                pl.BlockSpec((None, tkv, None, H, dh),
                             lambda b, qi, ki: (b, ki, 1, 0, 0)),   # k chunk
                pl.BlockSpec((None, tkv, None, H, dh),
                             lambda b, qi, ki: (b, ki, 2, 0, 0)),   # v chunk
            ],
            out_specs=pl.BlockSpec((None, tq, inner),
                                   lambda b, qi, ki: (b, qi, 0)),
            scratch_shapes=[
                pltpu.VMEM((H, tq, 1), jnp.float32),    # running max  m
                pltpu.VMEM((H, tq, 1), jnp.float32),    # running sum  l
                pltpu.VMEM((H, tq, dh), jnp.float32),   # running numerator
            ],
        ),
        compiler_params=pltpu.CompilerParams(
            dimension_semantics=("parallel", "parallel", "arbitrary")
        ),
    )(qkv, qkv, qkv)


# ----------------------------------------------------------------------------
# Full Attention.forward
# ----------------------------------------------------------------------------
def attention_forward(x, w_qkv, w_out, b_out, *, heads, dim_head):
    B, N, D = x.shape
    inner = heads * dim_head
    scale = dim_head ** (-0.5)

    xb = x.astype(jnp.bfloat16).reshape(B * N, D)

    # to_qkv (bias=False) -> bf16 intermediate, half the HBM round trip.
    qkv = linear(xb, w_qkv.astype(jnp.bfloat16), out_dtype=jnp.bfloat16)
    qkv = qkv.reshape(B, N, 3, heads, dim_head)   # free reshape, no transpose

    o = flash_attention(qkv, heads=heads, dim_head=dim_head, scale=scale)
    o = o.reshape(B * N, inner)                   # already (B, N, H*dh) layout

    out = linear(o, w_out.astype(jnp.bfloat16), b_out, out_dtype=jnp.float32)
    # nn.Dropout(p=0.0) is the identity.
    # TODO(synk): add a PRNG-based dropout mask for dropout > 0.0.
    return out.reshape(B, N, D)


def attention_reference(x, w_qkv, w_out, b_out, *, heads, dim_head):
    B, N, D = x.shape
    inner = heads * dim_head
    qkv = x @ w_qkv
    q, k, v = jnp.split(qkv, 3, axis=-1)

    def rearr(t):
        return jnp.transpose(t.reshape(B, N, heads, dim_head), (0, 2, 1, 3))

    q, k, v = rearr(q), rearr(k), rearr(v)
    dots = jnp.einsum("bhid,bhjd->bhij", q, k) * (dim_head ** (-0.5))
    attn = jax.nn.softmax(dots, axis=-1)
    out = jnp.einsum("bhij,bhjd->bhid", attn, v)
    out = jnp.transpose(out, (0, 2, 1, 3)).reshape(B, N, inner)
    return out @ w_out + b_out


if __name__ == "__main__":
    # Module defaults: heads=8, dim_head=64. Small, lane-friendly shapes.
    B, N, D = 2, 128, 128
    heads, dim_head = 8, 64
    inner = heads * dim_head

    key = jax.random.PRNGKey(0)
    kx, kq, ko, kb = jax.random.split(key, 4)
    x = jax.random.normal(kx, (B, N, D), dtype=jnp.float32)
    w_qkv = jax.random.normal(kq, (D, 3 * inner), dtype=jnp.float32) * (D ** -0.5)
    w_out = jax.random.normal(ko, (inner, D), dtype=jnp.float32) * (inner ** -0.5)
    b_out = jax.random.normal(kb, (D,), dtype=jnp.float32) * 0.02

    out = attention_forward(x, w_qkv, w_out, b_out, heads=heads, dim_head=dim_head)
    out = jax.block_until_ready(out)

    ref = attention_reference(x, w_qkv, w_out, b_out, heads=heads, dim_head=dim_head)
    ref = jax.block_until_ready(ref)

    assert out.shape == (B, N, D)
    assert bool(jnp.all(jnp.isfinite(out)))
    # bf16 MXU operands -> compare against the f32 reference with bf16 tolerance.
    max_err = float(jnp.max(jnp.abs(out - ref)))
    assert max_err < 7.5e-2, f"mismatch vs reference: max abs err = {max_err}"

    print("KERNEL_OK")
</pallas_src>

<mosaic_0001>
module attributes {stable_mosaic.version = 11 : i64} {
  func.func @kernel(%arg0: i32, %arg1: i32, %arg2: i32, %arg3: memref<128x128xbf16, #tpu.memory_space<vmem>>, %arg4: memref<128x512xbf16, #tpu.memory_space<vmem>>, %arg5: memref<128x512xbf16, #tpu.memory_space<vmem>>, %arg6: memref<128x512xf32, #tpu.memory_space<vmem>>) attributes {dimension_semantics = [#tpu.dimension_semantics<parallel>, #tpu.dimension_semantics<parallel>, #tpu.dimension_semantics<arbitrary>], iteration_bounds = array<i64: 2, 3, 1>, scalar_prefetch = 0 : i64, scratch_operands = 1 : i64, tpu.core_type = #tpu.core_type<tc>, window_params = [{transform_indices = @transform_0, window_bounds = array<i64: 128, 128>}, {transform_indices = @transform_1, window_bounds = array<i64: 128, 512>}, {transform_indices = @transform_2, window_bounds = array<i64: 128, 512>}]} {
    %c0_i32 = arith.constant 0 : i32
    %0 = arith.cmpi eq, %arg2, %c0_i32 : i32
    %1 = arith.extui %0 : i1 to i32
    %c0_i32_0 = arith.constant 0 : i32
    %2 = arith.cmpi ne, %1, %c0_i32_0 : i32
    scf.if %2 {
      %cst_10 = arith.constant 0.000000e+00 : f32
      %12 = vector.broadcast %cst_10 : f32 to vector<128x512xf32>
      %c0_11 = arith.constant 0 : index
      %c0_12 = arith.constant 0 : index
      %13 = vector.load %arg6[%c0_11, %c0_12] : memref<128x512xf32, #tpu.memory_space<vmem>>, vector<128x512xf32>
      tpu.vector_store %arg6[%c0_11, %c0_12], %12 {strides = array<i32>} : memref<128x512xf32, #tpu.memory_space<vmem>>, vector<128x512xf32>,
    } else {
    }
    %c0 = arith.constant 0 : index
    %c0_1 = arith.constant 0 : index
    %3 = vector.load %arg6[%c0, %c0_1] : memref<128x512xf32, #tpu.memory_space<vmem>>, vector<128x512xf32>
    %c0_2 = arith.constant 0 : index
    %c0_3 = arith.constant 0 : index
    %4 = vector.load %arg3[%c0_2, %c0_3] : memref<128x128xbf16, #tpu.memory_space<vmem>>, vector<128x128xbf16>
    %c0_4 = arith.constant 0 : index
    %c0_5 = arith.constant 0 : index
    %5 = vector.load %arg4[%c0_4, %c0_5] : memref<128x512xbf16, #tpu.memory_space<vmem>>, vector<128x512xbf16>
    %cst = arith.constant dense<0.000000e+00> : vector<128x512xf32>
    %6 = tpu.matmul %4, %5, %cst {dimension_numbers = #tpu.dot_dimension_numbers<[1], [0], [0], [1], [0, 0, 1, 1], [], []>} : vector<128x128xbf16>, vector<128x512xbf16>, vector<128x512xf32> -> vector<128x512xf32>
    %7 = arith.addf %3, %6 : vector<128x512xf32>
    %c0_6 = arith.constant 0 : index
    %c0_7 = arith.constant 0 : index
    %8 = vector.load %arg6[%c0_6, %c0_7] : memref<128x512xf32, #tpu.memory_space<vmem>>, vector<128x512xf32>
    tpu.vector_store %arg6[%c0_6, %c0_7], %7 {strides = array<i32>} : memref<128x512xf32, #tpu.memory_space<vmem>>, vector<128x512xf32>,
    %c0_i32_8 = arith.constant 0 : i32
    %9 = arith.cmpi eq, %arg2, %c0_i32_8 : i32
    %10 = arith.extui %9 : i1 to i32
    %c0_i32_9 = arith.constant 0 : i32
    %11 = arith.cmpi ne, %10, %c0_i32_9 : i32
    scf.if %11 {
      %c0_10 = arith.constant 0 : index
      %c0_11 = arith.constant 0 : index
      %12 = vector.load %arg6[%c0_10, %c0_11] : memref<128x512xf32, #tpu.memory_space<vmem>>, vector<128x512xf32>
      %13 = arith.truncf %12 : vector<128x512xf32> to vector<128x512xbf16>
      %c0_12 = arith.constant 0 : index
      %c0_13 = arith.constant 0 : index
      %14 = vector.load %arg5[%c0_12, %c0_13] : memref<128x512xbf16, #tpu.memory_space<vmem>>, vector<128x512xbf16>
      tpu.vector_store %arg5[%c0_12, %c0_13], %13 {strides = array<i32>} : memref<128x512xbf16, #tpu.memory_space<vmem>>, vector<128x512xbf16>,
    } else {
    }
    return
  }
  func.func @transform_0(%arg0: i32, %arg1: i32, %arg2: i32) -> (i32, i32) {
    %c0_i32 = arith.constant 0 : i32
    return %arg0, %arg2 : i32, i32
  }
  func.func @transform_1(%arg0: i32, %arg1: i32, %arg2: i32) -> (i32, i32) {
    %c0_i32 = arith.constant 0 : i32
    return %arg2, %arg1 : i32, i32
  }
  func.func @transform_2(%arg0: i32, %arg1: i32, %arg2: i32) -> (i32, i32) {
    %c0_i32 = arith.constant 0 : i32
    return %arg0, %arg1 : i32, i32
  }
}

</mosaic_0001>

<bundles_post_ra>
// kernel: tpu_custom_call.1
= control target key start
LH: loop header
LB: loop body
LE: loop exit
PB: predicated region body
PF: predicated region fallthrough
CT: control target
= control target key end

     0   :  { %s2344_s0 = inlined_call_operand.hbm [shape: bf16[256,128], index: 0, kind: input, shape index: {}]   ;;  %s2345_s1 = inlined_call_operand.hbm [shape: bf16[128,1536], index: 1, kind: input, shape index: {}]   ;;  %s2346_s2 = inlined_call_operand.hbm [shape: bf16[256,1536], index: 2, kind: output, shape index: {}]  }
   0x1   :  { %2354 = sst [smem:[#allocation18_spill]] %s2344_s0 }
   0x2   :  { %2355 = sst [smem:[#allocation19_spill]] %s2346_s2 }
   0x3   :  { %7 = vsyncpa [#allocation4], 0 }
   0x4   :  { %9 = vsyncpa [#allocation4 + $0x1], 0 }
   0x5   :  { %10 = vsyncpa [#allocation7], 0 }
   0x6   :  { %12 = vsyncpa [#allocation7 + $0x1], 0 }
   0x7   :  { %13 = vsyncpa [#allocation5], 0 }
   0x8   :  { %15 = vsyncpa [#allocation5 + $0x1], 0  ;;  %s1962_s9 = smov 0   ;;  %s1964_s10 = smov 0  }
   0x9   :  { %s1966_s11 = smov 0   ;;  %s1968_s12 = smov 0  }
   0xa   :  { %s1970_s13 = smov 0   ;;  %s1972_s14 = smov 0  }
   0xb   :  { %s1974_s15 = smov 0   ;;  %s1976_s16 = smov 0  }
   0xc   :  { %s1978_s17 = smov 0   ;;  %s1980_s18 = smov 0  }
   0xd   :  { %s1982_s19 = smov 0   ;;  %s1984_s20 = smov 0  }
   0xe   :  { %s1986_s21 = smov 0   ;;  %s1988_s22 = smov 0  }
   0xf LB: > { %2356 = sst [smem:[#allocation12_spill]] %s1917_s18  ;;  %s1405_s23 = sadd.s32 4294967295, %s1933_s22   ;;  %s1933_s22 = sphi %s1988_s22, %s21_s22   ;;  %s1929_s21 = sphi %s1986_s21, %s2384_s21   ;;  %s1925_s20 = sphi %s1984_s20, %s2395_s20   ;;  %s1921_s19 = sphi %s1982_s19, %s2382_s19   ;;  %s1917_s18 = sphi %s1980_s18, %s2394_s18   ;;  %s1913_s17 = sphi %s1978_s17, %s2393_s17   ;;  %s1909_s16 = sphi %s1976_s16, %s2392_s16   ;;  %s1905_s15 = sphi %s1974_s15, %s2391_s15   ;;  %s1901_s14 = sphi %s1972_s14, %s2390_s14   ;;  %s1897_s13 = sphi %s1970_s13, %s2389_s13   ;;  %s1893_s12 = sphi %s1968_s12, %s2388_s12   ;;  %s1889_s11 = sphi %s1966_s11, %s2387_s11   ;;  %s1885_s10 = sphi %s1964_s10, %s2386_s10   ;;  %s1881_s9 = sphi %s1962_s9, %s2385_s9  }
  0x10   : > { %2357 = sst [smem:[#allocation13_spill]] %s1929_s21  ;;  %p56_p0 = scmp.ne.s32.totalorder %s1913_s17, %s1909_s16 }
  0x11   : > { %p57_p1 = scmp.eq.s32.totalorder %s1933_s22, 0  ;;  %p62_p2 = scmp.ne.s32.totalorder %s1909_s16, %s1905_s15 }
  0x12   : > { %p2037_p3 = scmp.eq.s32.totalorder %s1405_s23, 0  ;;  %p2041_p4 = scmp.eq.s32.totalorder %s1405_s23, 5 }
  0x13   : > { %p58_p5 = por %p57_p1, %p56_p0  ;;  %p1550_p7 = scmp.lt.s32.totalorder %s1933_s22, 6 }
  0x14   : > { %p2049_p6 = por %p2037_p3, %p62_p2  ;;  %s142_s29 = sand.u32 1, %s1913_s17  }
  0x15   : > { %s1498_s30 = sshll.u32 %s1929_s21, 10  ;;  %s1409_s3 = sshll.u32 %s142_s29, 6 }
  0x16   : > { %s2361_s0 = sld [smem:[#allocation18_spill]]  ;;  %s146_s7 = scalar_lea.vmem [#allocation3], %s1409_s3 }
  0x17   : > { %s154_s8 = sshll.u32 %s146_s7, 4  ;;  %p2061_p8 = pnand %p1550_p7, %p58_p5  ;;  %s155_s8 = int_to_ptr.vmem [resolvable:$true] %s154_s8 }
  0x18   : > { %s143_s23 = scalar_lea.sflag [#allocation4], %s142_s29  ;;  %s1742_s25 = scalar_lea.vmem %s155_s8, 1024 }
  0x19   : > { %p1731_p9 = pneg %p2061_p8  ;;  %p1743_p10 = scmp.ne.s32.totalorder %s155_s8, %s1742_s25 }
  0x1a   : > { %s1935_s24 = smov [#allocation3]  }
  0x1b   : > { %p1745_p11 = pnand %p1743_p10, %p1731_p9  ;;  %s1747_s2 = sshll.u32 %s1935_s24, 4  ;;  %s1748_s2 = int_to_ptr.vmem [resolvable:$false] %s1747_s2 }
  0x1c   : > { %s153_s6 = scalar_lea.hbm %s2361_s0, %s1498_s30  ;;  %s1749_s30 = scalar_lea.vmem %s1748_s2, 2048 }
  0x1d   : > { %p1746_p12 = pneg %p1745_p11  ;;  %p1750_p13 = scmp.lt.s32.totalorder %s155_s8, %s1748_s2 }
  0x1e   : > { %p1751_p0 = scmp.lt.s32.totalorder %s1749_s30, %s1742_s25 }
  0x20   : > { %p1752_p2 = por %p1751_p0, %p1750_p13 }
  0x22   : > { %p1753_p5 = pnand %p1752_p2, %p1746_p12 }
  0x24   : > { %1756 = shalt.err (!%p1753_p5)
}
  0x25   : > { %s1936_s3 = smov 64   ;;  %s1937_s2 = smov 4  }
  0x26   : > { %1542 = dma.hbm_to_vmem [thread:$0]  (!%p2061_p8), %s153_s6, 1024, %s155_s8, %s143_s23, %s1936_s3, %s1936_s3, %s1937_s2  }
  0x27   : > { %p1415_p9 = scmp.ge.s32.totalorder %s1933_s22, 1  ;;  %p186_p10 = scmp.lt.s32.totalorder %s1933_s22, 7 }
  0x28   : > { %s1406_s25 = sadd.s32 4294967294, %s1933_s22   ;;  %s36_s29 = sadd.s32 1, %s1925_s20 }
  0x29   : > { %p2071_p11 = pnand %p1415_p9, %p186_p10  ;;  %s77_s4 = sadd.s32 1, %s1901_s14 }
  0x2a   : > { %p38_p12 = scmp.ge.s32.totalorder %s36_s29, 3  ;;  %p84_p13 = scmp.ne.s32.totalorder %s1901_s14, %s1897_s13 }
  0x2b   : > { %p90_p0 = scmp.ne.s32.totalorder %s1897_s13, %s1893_s12  ;;  %s105_s5 = sadd.s32 1, %s1889_s11 }
  0x2c   : > { %s2397_s29 = smov (%p38_p12, %s36_s29), 0  ;;  %s2365_s6 = sadd.s32 1, %s1929_s21 }
  0x2d   : > { %2364 = sst [smem:[#allocation14_spill]] %s2397_s29  ;;  %s2399_s6 = smov (!%p38_p12, %s2365_s6), %s1929_s21 }
  0x2e   : > { %s73_s7 = ssub.s32 %s1925_s20, %s2397_s29  ;;  %p2092_p8 = por %p84_p13, %p57_p1 }
  0x2f   : > { %p42_p2 = scmp.ge.s32.totalorder %s2399_s6, 2  ;;  %p75_p5 = scmp.eq.s32.totalorder %s73_s7, 0 }
  0x30   : > { %p2098_p9 = por %p90_p0, %p2037_p3  ;;  %p115_p10 = scmp.ne.s32.totalorder %s1889_s11, %s1885_s10 }
  0x31   : > { %s2401_s6 = smov (%p42_p2, %s2399_s6), 0  ;;  %p121_p13 = scmp.ne.s32.totalorder %s1885_s10, %s1881_s9 }
  0x32   : > { %2368 = sst [smem:[#allocation15_spill]] %s2401_s6  ;;  %s44_s23 = ssub.s32 %s1929_s21, %s2401_s6 }
  0x33   : > { %s2107_s15 = scalar_select %p75_p5, %s1901_s14, %s77_s4  }
  0x34   : > { %p2113_p1 = por %p2041_p4, %p115_p10  ;;  %p47_p12 = scmp.eq.s32.totalorder %s44_s23, 0 }
  0x35   : > { %2369 = sst [smem:[#allocation16_spill]] %s2107_s15  ;;  %s102_s26 = sor.u32 %s73_s7, %s44_s23 }
  0x36   : > { %s2370_s30 = scalar_select %p2113_p1, 1, 0 }
  0x37   : > { %p103_p3 = scmp.eq.s32.totalorder %s102_s26, 0  ;;  %s2372_s3 = sadd.s32 1, %s1913_s17 }
  0x38   : > { %2371 = sst [smem:[#allocation17_spill]] %s2370_s30  ;;  %p122_p0 = scmp.eq.s32.totalorder %s1406_s25, 5 }
  0x39   : > { %s2122_s2 = scalar_select %p47_p12, %s1913_s17, %s2372_s3  }
  0x3a   : > { %s2125_s0 = scalar_select %p103_p3, %s1889_s11, %s105_s5  }
  0x3b   : > { %s164_s4 = sand.u32 1, %s1901_s14   ;;  %p2128_p2 = por %p122_p0, %p121_p13 }
  0x3c   : > { %s1412_s29 = sshll.u32 %s164_s4, 8  ;;  %s1499_s6 = sshll.u32 %s1925_s20, 8 }
  0x3d   : > { %s2373_s27 = scalar_select %p2128_p2, 1, 0 }
  0x3e   : > { %s168_s21 = scalar_lea.vmem [#allocation6], %s1412_s29  ;;  %s177_s7 = scalar_lea.hbm %s2345_s1, %s1499_s6 }
  0x3f   : > { %s178_s15 = sshll.u32 %s168_s21, 4  ;;  %p2140_p4 = pnand %p1550_p7, %p2092_p8  ;;  %s179_s15 = int_to_ptr.vmem [resolvable:$true] %s178_s15 }
  0x40   : > { %s165_s25 = scalar_lea.sflag [#allocation7], %s164_s4  ;;  %s1770_s23 = scalar_lea.vmem %s179_s15, 4096 }
  0x41   : > { %p1759_p5 = pneg %p2140_p4  ;;  %p1771_p10 = scmp.ne.s32.totalorder %s179_s15, %s1770_s23 }
  0x42   : > { %s1938_s21 = smov [#allocation6]  }
  0x43   : > { %p1773_p12 = pnand %p1771_p10, %p1759_p5  ;;  %s1775_s29 = sshll.u32 %s1938_s21, 4  ;;  %s1776_s29 = int_to_ptr.vmem [resolvable:$false] %s1775_s29 }
  0x44   : > { %s1777_s18 = scalar_lea.vmem %s1776_s29, 8192  ;;  %p1778_p13 = scmp.lt.s32.totalorder %s179_s15, %s1776_s29 }
  0x45   : > { %p1774_p3 = pneg %p1773_p12  ;;  %p1779_p0 = scmp.lt.s32.totalorder %s1777_s18, %s1770_s23 }
  0x47   : > { %p1780_p2 = por %p1779_p0, %p1778_p13 }
  0x49   : > { %p1781_p1 = pnand %p1780_p2, %p1774_p3 }
  0x4b   : > { %1784 = shalt.err (!%p1781_p1)
}
  0x4c   : > { %s1939_s6 = smov 768   ;;  %s1940_s8 = smov 256  }
  0x4d   : > { %s1941_s30 = smov 16   ;;  %190 = sbr.rel (%p2071_p11) target bundleno = 393 (0x189), region = 28 }
  0x4e   : > { %1545 = dma.hbm_to_vmem [thread:$0]  (!%p2140_p4), %s177_s7, 4096, %s179_s15, %s165_s25, %s1939_s6, %s1940_s8, %s1941_s30  }
  0x4f   : > { %s192_s26 = sand.u32 (!%p2071_p11), 1, %s1909_s16  }
  0x50   : > { %s1416_s3 = sshll.u32 (!%p2071_p11), %s192_s26, 6  ;;  %s193_s4 = scalar_lea.sflag (!%p2071_p11), [#allocation4], %s192_s26 }
  0x51   : > { %s2151_s21 = scalar_lea.vmem (!%p2071_p11), [#allocation3], %s1416_s3 }
  0x52   : > { %1868 = dma.done.wait (%p2049_p6), %s193_s4, 1024  }
  0x53   : > { %1870 = vsyncadd (%p2049_p6), %s193_s4, 4294966272  ;;  %s201_s23 = sand.u32 1, %s1897_s13  }
  0x54   : > { %s1417_s5 = sshll.u32 %s201_s23, 8  ;;  %s202_s15 = scalar_lea.sflag [#allocation7], %s201_s23 }
  0x55   : > { %s2158_s7 = scalar_lea.vmem [#allocation6], %s1417_s5 }
  0x56   : > { %1872 = dma.done.wait (%p2098_p9), %s202_s15, 4096  }
  0x57   : > { %1874 = vsyncadd (%p2098_p9), %s202_s15, 4294963200  ;;  %v1942_v0 = vmov 0   ;;  %v1673_v1 = vld [vmem:[%s2158_s7 + $0xe4] ss:$16 sps:$4 sm:$0xff]   ;;  %v1675_v2 = vld [vmem:[%s2158_s7 + $0xec] ss:$16 sps:$4 sm:$0xff]  }
  0x58   : > { %657 = vmatprep.mubr.bf16.mxu0 %v1942_v0  ;;  %770 = vmatprep.mubr.bf16.mxu1 %v1942_v0  ;;  %v1677_v3 = vld [vmem:[%s2158_s7 + $0xe0] ss:$16 sps:$4 sm:$0xff]   ;;  %v1678_v4 = vld [vmem:[%s2158_s7 + $0xe8] ss:$16 sps:$4 sm:$0xff]   ;;  %v1679_v5 = vld [vmem:[%s2158_s7 + $0xc4] ss:$16 sps:$4 sm:$0xff]  }
  0x59   : > { %625 = vmatprep.subr.bf16.mxu0 %v1673_v1  ;;  %738 = vmatprep.subr.bf16.mxu1 %v1675_v2  ;;  %v1681_v6 = vld [vmem:[%s2158_s7 + $0xcc] ss:$16 sps:$4 sm:$0xff]   ;;  %v1683_v7 = vld [vmem:[%s2158_s7 + $0xc0] ss:$16 sps:$4 sm:$0xff]   ;;  %v1684_v8 = vld [vmem:[%s2158_s7 + $0xc8] ss:$16 sps:$4 sm:$0xff]  }
  0x5a   : > { %626 = vmatpush1.bf16.msra.mxu0 %v1677_v3  ;;  %739 = vmatpush1.bf16.msra.mxu1 %v1678_v4  ;;  %v1685_v9 = vld [vmem:[%s2158_s7 + $0xa4] ss:$16 sps:$4 sm:$0xff]   ;;  %v1687_v10 = vld [vmem:[%s2158_s7 + $0xac] ss:$16 sps:$4 sm:$0xff]   ;;  %v1689_v11 = vld [vmem:[%s2158_s7 + $0xa0] ss:$16 sps:$4 sm:$0xff]  }
  0x5b   : > { %627 = vmatprep.subr.bf16.mxu0 %v1679_v5  ;;  %740 = vmatprep.subr.bf16.mxu1 %v1681_v6  ;;  %v1690_v12 = vld [vmem:[%s2158_s7 + $0xa8] ss:$16 sps:$4 sm:$0xff]   ;;  %v1691_v13 = vld [vmem:[%s2158_s7 + $0x84] ss:$16 sps:$4 sm:$0xff]   ;;  %v1693_v14 = vld [vmem:[%s2158_s7 + $0x8c] ss:$16 sps:$4 sm:$0xff]  }
  0x5c   : > { %v1695_v15 = vld [vmem:[%s2158_s7 + $0x80] ss:$16 sps:$4 sm:$0xff]   ;;  %v1696_v16 = vld [vmem:[%s2158_s7 + $0x88] ss:$16 sps:$4 sm:$0xff]   ;;  %v1697_v17 = vld [vmem:[%s2158_s7 + $0x64] ss:$16 sps:$4 sm:$0xff]  }
  0x5d   : > { %v1699_v18 = vld [vmem:[%s2158_s7 + $0x6c] ss:$16 sps:$4 sm:$0xff]   ;;  %v1701_v19 = vld [vmem:[%s2158_s7 + $0x60] ss:$16 sps:$4 sm:$0xff]   ;;  %v1702_v20 = vld [vmem:[%s2158_s7 + $0x68] ss:$16 sps:$4 sm:$0xff]  }
  0x5e   : > { %628 = vmatpush1.bf16.msra.mxu0 %v1683_v7  ;;  %741 = vmatpush1.bf16.msra.mxu1 %v1684_v8  ;;  %v1703_v21 = vld [vmem:[%s2158_s7 + $0x44] ss:$16 sps:$4 sm:$0xff]   ;;  %v1705_v22 = vld [vmem:[%s2158_s7 + $0x4c] ss:$16 sps:$4 sm:$0xff]   ;;  %v1707_v23 = vld [vmem:[%s2158_s7 + $0x40] ss:$16 sps:$4 sm:$0xff]  }
  0x5f   : > { %629 = vmatprep.subr.bf16.mxu0 %v1685_v9  ;;  %742 = vmatprep.subr.bf16.mxu1 %v1687_v10  ;;  %v1708_v24 = vld [vmem:[%s2158_s7 + $0x48] ss:$16 sps:$4 sm:$0xff]   ;;  %v1709_v25 = vld [vmem:[%s2158_s7 + $0x24] ss:$16 sps:$4 sm:$0xff]   ;;  %v1711_v26 = vld [vmem:[%s2158_s7 + $0x2c] ss:$16 sps:$4 sm:$0xff]  }
  0x60   : > { %v1713_v27 = vld [vmem:[%s2158_s7 + $0x20] ss:$16 sps:$4 sm:$0xff]   ;;  %v1714_v28 = vld [vmem:[%s2158_s7 + $0x28] ss:$16 sps:$4 sm:$0xff]   ;;  %v1715_v29 = vld [vmem:[%s2158_s7 + $0x4] ss:$16 sps:$4 sm:$0xff]  }
  0x61   : > { %v1717_v30 = vld [vmem:[%s2158_s7 + $0xc] ss:$16 sps:$4 sm:$0xff]   ;;  %v1719_v31 = vld [vmem:[%s2158_s7] ss:$16 sps:$4 sm:$0xff]   ;;  %v1720_v32 = vld [vmem:[%s2158_s7 + $0x8] ss:$16 sps:$4 sm:$0xff]  }
  0x62   : > { %630 = vmatpush1.bf16.msra.mxu0 %v1689_v11  ;;  %743 = vmatpush1.bf16.msra.mxu1 %v1690_v12  ;;  %v1721_v33 = vld [vmem:[%s2151_s21] sm:$0xff]   ;;  %v1722_v34 = vld [vmem:[%s2151_s21 + $0x8] sm:$0xff]   ;;  %v1723_v35 = vld [vmem:[%s2151_s21 + $0x10] sm:$0xff]   ;;  %s228_s28 = sand.u32 1, %s1885_s10   ;;  %s2375_s25 = sld [smem:[#allocation12_spill]] }
  0x63   : > { %631 = vmatprep.subr.bf16.mxu0 %v1691_v13  ;;  %744 = vmatprep.subr.bf16.mxu1 %v1693_v14  ;;  %v1724_v36 = vld [vmem:[%s2151_s21 + $0x18] sm:$0xff]   ;;  %v1725_v37 = vld [vmem:[%s2151_s21 + $0x20] sm:$0xff]   ;;  %v1726_v38 = vld [vmem:[%s2151_s21 + $0x28] sm:$0xff]   ;;  %s1418_s24 = sshll.u32 %s228_s28, 8  ;;  %s1532_s29 = smul.u32 192, %s1921_s19 }
  0x64   : > { %v1727_v39 = vld [vmem:[%s2151_s21 + $0x30] sm:$0xff]   ;;  %v1728_v40 = vld [vmem:[%s2151_s21 + $0x38] sm:$0xff]   ;;  %s2223_s12 = scalar_lea.vmem [#allocation8], %s1418_s24  ;;  %s2376_s30 = sld [smem:[#allocation17_spill]] }
  0x65   : > { %s1287_s8 = sshll.u32 %s2223_s12, 4  ;;  %s2377_s4 = sld [smem:[#allocation19_spill]]  ;;  %s2263_s8 = int_to_ptr.vmem [resolvable:$true] %s1287_s8 }
  0x66   : > { %632 = vmatpush1.bf16.msra.mxu0 %v1695_v15  ;;  %745 = vmatpush1.bf16.msra.mxu1 %v1696_v16  ;;  %s2269_s23 = scalar_lea.sflag [#allocation5], %s228_s28  ;;  %s1785_s5 = scalar_lea.vmem %s2263_s8, 4096 }
  0x67   : > { %633 = vmatprep.subr.bf16.mxu0 %v1697_v17  ;;  %746 = vmatprep.subr.bf16.mxu1 %v1699_v18  ;;  %p1786_p6 = scmp.ne.s32.totalorder %s2263_s8, %s1785_s5  ;;  %s1943_s15 = smov [#allocation8]  }
  0x68   : > { %s1493_s18 = sshll.u32 %s2375_s25, 2  ;;  %s1789_s7 = sshll.u32 %s1943_s15, 4  ;;  %s1790_s7 = int_to_ptr.vmem [resolvable:$false] %s1789_s7 }
  0x69   : > { %s1284_s6 = sadd.s32 %s1532_s29, %s1493_s18  ;;  %s1791_s24 = scalar_lea.vmem %s1790_s7, 8192 }
  0x6a   : > { %634 = vmatpush1.bf16.msra.mxu0 %v1701_v19  ;;  %747 = vmatpush1.bf16.msra.mxu1 %v1702_v20  ;;  %s1495_s19 = sshll.u32 %s1284_s6, 6  ;;  %p2378_p7 = scmp.ne.s32.totalorder %s2376_s30, 0 }
  0x6b   : > { %635 = vmatprep.subr.bf16.mxu0 %v1703_v21  ;;  %748 = vmatprep.subr.bf16.mxu1 %v1705_v22  ;;  %s2261_s21 = scalar_lea.hbm %s2377_s4, %s1495_s19  ;;  %p1792_p9 = scmp.lt.s32.totalorder %s2263_s8, %s1790_s7 }
  0x6c   : > { %p1787_p11 = pnand %p1786_p6, %p2378_p7  ;;  %p1793_p1 = scmp.lt.s32.totalorder %s1791_s24, %s1785_s5 }
  0x6e   : > { %636 = vmatpush1.bf16.msra.mxu0 %v1707_v23  ;;  %749 = vmatpush1.bf16.msra.mxu1 %v1708_v24  ;;  %p1788_p8 = pneg %p1787_p11  ;;  %p1794_p2 = por %p1793_p1, %p1792_p9 }
  0x6f   : > { %637 = vmatprep.subr.bf16.mxu0 %v1709_v25  ;;  %750 = vmatprep.subr.bf16.mxu1 %v1711_v26 }
  0x70   : > { %p1795_p4 = pnand %p1794_p2, %p1788_p8 }
  0x72   : > { %638 = vmatpush1.bf16.msra.mxu0 %v1713_v27  ;;  %751 = vmatpush1.bf16.msra.mxu1 %v1714_v28 }
  0x73   : > { %639 = vmatprep.subr.bf16.mxu0 %v1715_v29  ;;  %752 = vmatprep.subr.bf16.mxu1 %v1717_v30 }
  0x76   : > { %640 = vmatpush1.bf16.msra.mxu0 %v1719_v31  ;;  %753 = vmatpush1.bf16.msra.mxu1 %v1720_v32 }
  0x79   : > { %658 = vmatmul.mubr.bf16.vlgmr.msra.gmra.mxu0 %v1721_v33  ;;  %771 = vmatmul.mubr.bf16.vlgmr.msra.gmra.mxu1 %v1721_v33 }
  0x7a   : > { %667 = vmatprep.mubr.bf16.mxu0 %v1942_v0  ;;  %780 = vmatprep.mubr.bf16.mxu1 %v1942_v0 }
  0x81   : > { %668 = vmatmul.mubr.bf16.gmra.mxu0 %v1722_v34  ;;  %781 = vmatmul.mubr.bf16.gmra.mxu1 %v1722_v34 }
  0x82   : > { %677 = vmatprep.mubr.bf16.mxu0 %v1942_v0  ;;  %790 = vmatprep.mubr.bf16.mxu1 %v1942_v0 }
  0x89   : > { %678 = vmatmul.mubr.bf16.gmra.mxu0 %v1723_v35  ;;  %791 = vmatmul.mubr.bf16.gmra.mxu1 %v1723_v35 }
  0x8a   : > { %687 = vmatprep.mubr.bf16.mxu0 %v1942_v0  ;;  %800 = vmatprep.mubr.bf16.mxu1 %v1942_v0 }
  0x91   : > { %688 = vmatmul.mubr.bf16.gmra.mxu0 %v1724_v36  ;;  %801 = vmatmul.mubr.bf16.gmra.mxu1 %v1724_v36 }
  0x92   : > { %697 = vmatprep.mubr.bf16.mxu0 %v1942_v0  ;;  %810 = vmatprep.mubr.bf16.mxu1 %v1942_v0 }
  0x99   : > { %698 = vmatmul.mubr.bf16.gmra.mxu0 %v1725_v37  ;;  %811 = vmatmul.mubr.bf16.gmra.mxu1 %v1725_v37 }
  0x9a   : > { %707 = vmatprep.mubr.bf16.mxu0 %v1942_v0  ;;  %820 = vmatprep.mubr.bf16.mxu1 %v1942_v0 }
  0xa1   : > { %708 = vmatmul.mubr.bf16.gmra.mxu0 %v1726_v38  ;;  %821 = vmatmul.mubr.bf16.gmra.mxu1 %v1726_v38 }
  0xa2   : > { %717 = vmatprep.mubr.bf16.mxu0 %v1942_v0  ;;  %830 = vmatprep.mubr.bf16.mxu1 %v1942_v0 }
  0xa9   : > { %718 = vmatmul.mubr.bf16.gmra.mxu0 %v1727_v39  ;;  %831 = vmatmul.mubr.bf16.gmra.mxu1 %v1727_v39 }
  0xaa   : > { %727 = vmatprep.mubr.bf16.mxu0 %v1942_v0  ;;  %840 = vmatprep.mubr.bf16.mxu1 %v1942_v0 }
  0xb1   : > { %728 = vmatmul.mubr.bf16.gmra.mxu0 %v1728_v40  ;;  %841 = vmatmul.mubr.bf16.gmra.mxu1 %v1728_v40 }
 0x139   : > { %v659_v41 = vpop.f32.mrf.mxu0  ;;  %v772_v42 = vpop.f32.mrf.mxu1 }
 0x13b   : > { %v661_v43 = vpop.f32.mrf.mxu0  ;;  %v774_v44 = vpop.f32.mrf.mxu1 }
 0x13c   : > { %v1500_v45 = vpack.c.bf16 %v661_v43, %v659_v41  ;;  %v1501_v46 = vpack.c.bf16 %v774_v44, %v772_v42 }
 0x13d   : > { %v663_v47 = vpop.f32.mrf.mxu0  ;;  %v776_v48 = vpop.f32.mrf.mxu1 }
 0x13e   : > { %1238 = vst [vmem:[%s2223_s12] sm:$0xff] %v1500_v45  ;;  %1239 = vst [vmem:[%s2223_s12 + $0x8] sm:$0xff] %v1501_v46 }
 0x13f   : > { %v665_v49 = vpop.f32.mrf.mxu0  ;;  %v778_v50 = vpop.f32.mrf.mxu1 }
 0x140   : > { %v1502_v51 = vpack.c.bf16 %v665_v49, %v663_v47  ;;  %v1503_v52 = vpack.c.bf16 %v778_v50, %v776_v48 }
 0x141   : > { %v669_v53 = vpop.f32.mrf.mxu0  ;;  %v782_v54 = vpop.f32.mrf.mxu1 }
 0x142   : > { %1240 = vst [vmem:[%s2223_s12 + $0x10] sm:$0xff] %v1502_v51  ;;  %1241 = vst [vmem:[%s2223_s12 + $0x18] sm:$0xff] %v1503_v52 }
 0x143   : > { %v671_v55 = vpop.f32.mrf.mxu0  ;;  %v784_v56 = vpop.f32.mrf.mxu1 }
 0x144   : > { %v1504_v57 = vpack.c.bf16 %v671_v55, %v669_v53  ;;  %v1505_v58 = vpack.c.bf16 %v784_v56, %v782_v54 }
 0x145   : > { %v673_v59 = vpop.f32.mrf.mxu0  ;;  %v786_v60 = vpop.f32.mrf.mxu1 }
 0x146   : > { %1242 = vst [vmem:[%s2223_s12 + $0x20] sm:$0xff] %v1504_v57  ;;  %1243 = vst [vmem:[%s2223_s12 + $0x28] sm:$0xff] %v1505_v58 }
 0x147   : > { %v675_v61 = vpop.f32.mrf.mxu0  ;;  %v788_v62 = vpop.f32.mrf.mxu1 }
 0x148   : > { %v1506_v63 = vpack.c.bf16 %v675_v61, %v673_v59  ;;  %v1507_v0 = vpack.c.bf16 %v788_v62, %v786_v60 }
 0x149   : > { %v679_v1 = vpop.f32.mrf.mxu0  ;;  %v792_v2 = vpop.f32.mrf.mxu1 }
 0x14a   : > { %1244 = vst [vmem:[%s2223_s12 + $0x30] sm:$0xff] %v1506_v63  ;;  %1245 = vst [vmem:[%s2223_s12 + $0x38] sm:$0xff] %v1507_v0 }
 0x14b   : > { %v681_v3 = vpop.f32.mrf.mxu0  ;;  %v794_v4 = vpop.f32.mrf.mxu1 }
 0x14c   : > { %v1508_v5 = vpack.c.bf16 %v681_v3, %v679_v1  ;;  %v1509_v6 = vpack.c.bf16 %v794_v4, %v792_v2 }
 0x14d   : > { %v683_v7 = vpop.f32.mrf.mxu0  ;;  %v796_v8 = vpop.f32.mrf.mxu1 }
 0x14e   : > { %1246 = vst [vmem:[%s2223_s12 + $0x40] sm:$0xff] %v1508_v5  ;;  %1247 = vst [vmem:[%s2223_s12 + $0x48] sm:$0xff] %v1509_v6 }
 0x14f   : > { %v685_v9 = vpop.f32.mrf.mxu0  ;;  %v798_v10 = vpop.f32.mrf.mxu1 }
 0x150   : > { %v1510_v11 = vpack.c.bf16 %v685_v9, %v683_v7  ;;  %v1511_v12 = vpack.c.bf16 %v798_v10, %v796_v8 }
 0x151   : > { %v689_v13 = vpop.f32.mrf.mxu0  ;;  %v802_v14 = vpop.f32.mrf.mxu1 }
 0x152   : > { %1248 = vst [vmem:[%s2223_s12 + $0x50] sm:$0xff] %v1510_v11  ;;  %1249 = vst [vmem:[%s2223_s12 + $0x58] sm:$0xff] %v1511_v12 }
 0x153   : > { %v691_v15 = vpop.f32.mrf.mxu0  ;;  %v804_v16 = vpop.f32.mrf.mxu1 }
 0x154   : > { %v1512_v17 = vpack.c.bf16 %v691_v15, %v689_v13  ;;  %v1513_v18 = vpack.c.bf16 %v804_v16, %v802_v14 }
 0x155   : > { %v693_v19 = vpop.f32.mrf.mxu0  ;;  %v806_v20 = vpop.f32.mrf.mxu1 }
 0x156   : > { %1250 = vst [vmem:[%s2223_s12 + $0x60] sm:$0xff] %v1512_v17  ;;  %1251 = vst [vmem:[%s2223_s12 + $0x68] sm:$0xff] %v1513_v18 }
 0x157   : > { %v695_v21 = vpop.f32.mrf.mxu0  ;;  %v808_v22 = vpop.f32.mrf.mxu1 }
 0x158   : > { %v1514_v23 = vpack.c.bf16 %v695_v21, %v693_v19  ;;  %v1515_v24 = vpack.c.bf16 %v808_v22, %v806_v20 }
 0x159   : > { %v699_v25 = vpop.f32.mrf.mxu0  ;;  %v812_v26 = vpop.f32.mrf.mxu1 }
 0x15a   : > { %1252 = vst [vmem:[%s2223_s12 + $0x70] sm:$0xff] %v1514_v23  ;;  %1253 = vst [vmem:[%s2223_s12 + $0x78] sm:$0xff] %v1515_v24 }
 0x15b   : > { %v701_v27 = vpop.f32.mrf.mxu0  ;;  %v814_v28 = vpop.f32.mrf.mxu1 }
 0x15c   : > { %v1516_v29 = vpack.c.bf16 %v701_v27, %v699_v25  ;;  %v1517_v30 = vpack.c.bf16 %v814_v28, %v812_v26 }
 0x15d   : > { %v703_v31 = vpop.f32.mrf.mxu0  ;;  %v816_v32 = vpop.f32.mrf.mxu1 }
 0x15e   : > { %1254 = vst [vmem:[%s2223_s12 + $0x80] sm:$0xff] %v1516_v29  ;;  %1255 = vst [vmem:[%s2223_s12 + $0x88] sm:$0xff] %v1517_v30 }
 0x15f   : > { %v705_v33 = vpop.f32.mrf.mxu0  ;;  %v818_v34 = vpop.f32.mrf.mxu1 }
 0x160   : > { %v1518_v35 = vpack.c.bf16 %v705_v33, %v703_v31  ;;  %v1519_v36 = vpack.c.bf16 %v818_v34, %v816_v32 }
 0x161   : > { %v709_v37 = vpop.f32.mrf.mxu0  ;;  %v822_v38 = vpop.f32.mrf.mxu1 }
 0x162   : > { %1256 = vst [vmem:[%s2223_s12 + $0x90] sm:$0xff] %v1518_v35  ;;  %1257 = vst [vmem:[%s2223_s12 + $0x98] sm:$0xff] %v1519_v36 }
 0x163   : > { %v711_v39 = vpop.f32.mrf.mxu0  ;;  %v824_v40 = vpop.f32.mrf.mxu1 }
 0x164   : > { %v1520_v41 = vpack.c.bf16 %v711_v39, %v709_v37  ;;  %v1521_v42 = vpack.c.bf16 %v824_v40, %v822_v38 }
 0x165   : > { %v713_v43 = vpop.f32.mrf.mxu0  ;;  %v826_v44 = vpop.f32.mrf.mxu1 }
 0x166   : > { %1258 = vst [vmem:[%s2223_s12 + $0xa0] sm:$0xff] %v1520_v41  ;;  %1259 = vst [vmem:[%s2223_s12 + $0xa8] sm:$0xff] %v1521_v42 }
 0x167   : > { %v715_v45 = vpop.f32.mrf.mxu0  ;;  %v828_v46 = vpop.f32.mrf.mxu1 }
 0x168   : > { %v1522_v47 = vpack.c.bf16 %v715_v45, %v713_v43  ;;  %v1523_v48 = vpack.c.bf16 %v828_v46, %v826_v44 }
 0x169   : > { %v719_v49 = vpop.f32.mrf.mxu0  ;;  %v832_v50 = vpop.f32.mrf.mxu1 }
 0x16a   : > { %1260 = vst [vmem:[%s2223_s12 + $0xb0] sm:$0xff] %v1522_v47  ;;  %1261 = vst [vmem:[%s2223_s12 + $0xb8] sm:$0xff] %v1523_v48 }
 0x16b   : > { %v721_v51 = vpop.f32.mrf.mxu0  ;;  %v834_v52 = vpop.f32.mrf.mxu1 }
 0x16c   : > { %v1524_v53 = vpack.c.bf16 %v721_v51, %v719_v49  ;;  %v1525_v54 = vpack.c.bf16 %v834_v52, %v832_v50 }
 0x16d   : > { %v723_v55 = vpop.f32.mrf.mxu0  ;;  %v836_v56 = vpop.f32.mrf.mxu1 }
 0x16e   : > { %1262 = vst [vmem:[%s2223_s12 + $0xc0] sm:$0xff] %v1524_v53  ;;  %1263 = vst [vmem:[%s2223_s12 + $0xc8] sm:$0xff] %v1525_v54 }
 0x16f   : > { %v725_v57 = vpop.f32.mrf.mxu0  ;;  %v838_v58 = vpop.f32.mrf.mxu1 }
 0x170   : > { %v1526_v59 = vpack.c.bf16 %v725_v57, %v723_v55  ;;  %v1527_v60 = vpack.c.bf16 %v838_v58, %v836_v56 }
 0x171   : > { %v729_v61 = vpop.f32.mrf.mxu0  ;;  %v842_v62 = vpop.f32.mrf.mxu1 }
 0x172   : > { %1264 = vst [vmem:[%s2223_s12 + $0xd0] sm:$0xff] %v1526_v59  ;;  %1265 = vst [vmem:[%s2223_s12 + $0xd8] sm:$0xff] %v1527_v60 }
 0x173   : > { %v731_v63 = vpop.f32.mrf.mxu0  ;;  %v844_v0 = vpop.f32.mrf.mxu1 }
 0x174   : > { %v1528_v1 = vpack.c.bf16 %v731_v63, %v729_v61  ;;  %v1529_v2 = vpack.c.bf16 %v844_v0, %v842_v62 }
 0x175   : > { %v733_v3 = vpop.f32.mrf.mxu0  ;;  %v846_v4 = vpop.f32.mrf.mxu1 }
 0x176   : > { %1266 = vst [vmem:[%s2223_s12 + $0xe0] sm:$0xff] %v1528_v1  ;;  %1267 = vst [vmem:[%s2223_s12 + $0xe8] sm:$0xff] %v1529_v2 }
 0x177   : > { %v735_v5 = vpop.f32.mrf.mxu0  ;;  %v848_v6 = vpop.f32.mrf.mxu1 }
 0x178   : > { %v1530_v7 = vpack.c.bf16 %v735_v5, %v733_v3  ;;  %v1531_v8 = vpack.c.bf16 %v848_v6, %v846_v4 }
 0x17a   : > { %1268 = vst [vmem:[%s2223_s12 + $0xf0] sm:$0xff] %v1530_v7  ;;  %1269 = vst [vmem:[%s2223_s12 + $0xf8] sm:$0xff] %v1531_v8 }
 0x17b   : > { %1798 = shalt.err (!%p1795_p4)
}
 0x17c   : > { %s1799_s28 = scalar_lea.hbm %s2261_s21, 4096  ;;  %s1803_s29 = scalar_lea.hbm %s2377_s4, 24576 }
 0x17d   : > { %p1800_p5 = scmp.ne.s32.totalorder %s2261_s21, %s1799_s28  ;;  %p1804_p3 = scmp.lt.s32.totalorder %s2261_s21, %s2377_s4 }
 0x17e   : > { %p1805_p13 = scmp.lt.s32.totalorder %s1803_s29, %s1799_s28 }
 0x17f   : > { %p1801_p10 = pnand %p1800_p5, %p2378_p7 }
 0x180   : > { %p1806_p0 = por %p1805_p13, %p1804_p3 }
 0x181   : > { %p1802_p12 = pneg %p1801_p10 }
 0x183   : > { %p1807_p6 = pnand %p1806_p0, %p1802_p12 }
 0x185   : > { %1810 = shalt.err (!%p1807_p6)
}
 0x186   : > { %s1944_s19 = smov 256   ;;  %s1945_s26 = smov 768  }
 0x187   : > { %s1946_s3 = smov 16  }
 0x188   : > { %1537 = dma.vmem_to_hbm [thread:$0]  (%p2378_p7), %s2263_s8, 4096, %s2261_s21, %s2269_s23, %s1944_s19, %s1945_s26, %s1946_s3  }
 0x189 PF: > { %p1551_p11 = scmp.ge.s32.totalorder %s1933_s22, 2  ;;  %s1302_s5 = sand.u32 1, %s1881_s9  }
 0x18a   : > { %p2379_p8 = scmp.ne.s32.totalorder %s2373_s27, 0  ;;  %s1303_s15 = scalar_lea.sflag [#allocation5], %s1302_s5 }
 0x18c   : > { %p1547_p9 = pnand %p1551_p11, %p2379_p8 }
 0x18e   : > { %p1548_p1 = pneg %p1547_p9 }
 0x190   : > { %1876 = dma.done.wait (%p1548_p1), %s1303_s15, 4096  }
 0x191   : > { %1878 = vsyncadd (%p1548_p1), %s1303_s15, 4294963200  ;;  %s21_s22 = sadd.s32 1, %s1933_s22   ;;  %s2381_s8 = sld [smem:[#allocation16_spill]] }
 0x192   : > { %p2297_p2 = scmp.ge.s32.totalorder %s21_s22, 8   ;;  %s2382_s19 = sld [smem:[#allocation13_spill]] }
 0x193   : > { %s2383_s27 = sld [smem:[#allocation14_spill]]  ;;  %s2385_s9 = smov %s1885_s10 }
 0x194   : > { %s2384_s21 = sld [smem:[#allocation15_spill]]  ;;  %s2386_s10 = smov %s1889_s11 }
 0x195   : > { %s2387_s11 = smov %s2125_s0  ;;  %s2388_s12 = smov %s1897_s13 }
 0x196   : > { %s2389_s13 = smov %s1901_s14  ;;  %s2391_s15 = smov %s1909_s16 }
 0x197   : > { %s2390_s14 = smov %s2381_s8  ;;  %s2392_s16 = smov %s1913_s17 }
 0x198   : > { %s2393_s17 = smov %s2122_s2  ;;  %s2394_s18 = smov %s1925_s20 }
 0x199   : > { %s2395_s20 = smov %s2383_s27  ;;  %20 = sbr.rel (!%p2297_p2) target bundleno = 15 (0xf), region = 94 }
 0x19e   :  { %1308 = vsyncpa [#allocation4], 1 }
 0x19f   :  { %1310 = vsyncpa [#allocation4 + $0x1], 1 }
 0x1a0   :  { %1311 = vsyncpa [#allocation7], 1 }
 0x1a1   :  { %1313 = vsyncpa [#allocation7 + $0x1], 1 }
 0x1a2   :  { %1314 = vsyncpa [#allocation5], 1 }
 0x1a3   :  { %1316 = vsyncpa [#allocation5 + $0x1], 1 }

</bundles_post_ra>
